<compile_context>
chip_gen: v7x
topology: tpu7x:2x2x1
jax: 0.10.0
libtpu: 0.0.40
codegen_flags: <defaults>
</compile_context>

<pallas_src>
import math

import jax
import jax.numpy as jnp
from jax.experimental import pallas as pl
from jax.experimental.pallas import tpu as pltpu

# Module hyper-parameters (match TauRLayer.__init__ defaults)
EPSILON = 1e-06
ALPHA = 0.1
BETA = 0.1
MIN_DENOMINATOR = 1e-05


def _epilogue(z, tn, out_dtype):
    """z = [x@Wp + bp | x@Wr + br] in f32; returns the tau tile."""
    progress = jnp.tanh(z[:, :tn])                 # tanh(progress_transform(x))
    risk = jnp.maximum(z[:, tn:], 0.0)             # relu(risk_transform(x))
    den = jnp.maximum(risk + (BETA + EPSILON), MIN_DENOMINATOR)
    tau = jnp.tanh((progress + ALPHA) * pl.reciprocal(den, approx=True))
    # torch.clamp(tau, -10, 10) is a no-op after tanh; omitted.
    return tau.astype(out_dtype)


def _tau_r_kernel_single_k(x_ref, w_ref, b_ref, o_ref):
    """Fast path for n_k == 1: no accumulator scratch, single fused MXU pass."""
    z = jnp.dot(x_ref[...], w_ref[...], preferred_element_type=jnp.float32)
    z = z + b_ref[...]
    o_ref[...] = _epilogue(z, o_ref.shape[-1], o_ref.dtype)


def _tau_r_kernel_multi_k(x_ref, w_ref, b_ref, o_ref, acc_ref):
    """General path: reduce over k into a persistent f32 VMEM accumulator."""
    k = pl.program_id(2)

    @pl.when(k == 0)
    def _init():
        acc_ref[...] = jnp.zeros_like(acc_ref)

    acc_ref[...] += jnp.dot(
        x_ref[...], w_ref[...], preferred_element_type=jnp.float32
    )

    @pl.when(k == pl.num_programs(2) - 1)
    def _finalize():
        z = acc_ref[...] + b_ref[...]
        o_ref[...] = _epilogue(z, o_ref.shape[-1], o_ref.dtype)


def _round_up(value, multiple):
    return (value + multiple - 1) // multiple * multiple


def make_tau_r_layer(wp, bp, wr, br, *, out_dtype=jnp.float32,
                     mxu_dtype=jnp.bfloat16):
    """Pack parameters once; return apply(x) -> tau.

    wp/wr: [D_in, D_out]; bp/br: [D_out] or [1, D_out].
    """
    D_in, D_out = wp.shape

    # ---- Output-column tile ------------------------------------------------
    # Small D_out: block == full dim (legal), no padded epilogue EUP work.
    # Large D_out: lane-dense 128/256-wide tiles -> unmasked vst.
    if D_out <= 256:
        tn = D_out
    elif D_out % 256 == 0:
        tn = 256
    else:
        tn = 128
    D_out_p = _round_up(D_out, tn)
    n_j = D_out_p // tn

    # ---- K tile -------------------------------------------------------------
    # No K padding at all when D_in fits one block; otherwise big K tiles.
    if D_in <= 2048:
        tk = D_in
        D_in_p = D_in
    else:
        D_in_p = _round_up(D_in, 512)
        tk = next(c for c in (2048, 1536, 1024, 512) if D_in_p % c == 0)
    n_k = D_in_p // tk

    # ---- One-time parameter packing (hoisted out of the per-call hot path) --
    f32 = jnp.float32
    wp_p = jnp.pad(jnp.asarray(wp, f32), ((0, D_in_p - D_in), (0, D_out_p - D_out)))
    wr_p = jnp.pad(jnp.asarray(wr, f32), ((0, D_in_p - D_in), (0, D_out_p - D_out)))
    bp_p = jnp.pad(jnp.asarray(bp, f32).reshape(1, -1), ((0, 0), (0, D_out_p - D_out)))
    br_p = jnp.pad(jnp.asarray(br, f32).reshape(1, -1), ((0, 0), (0, D_out_p - D_out)))

    # Per-output-tile j: columns [j*2tn:(j+1)*2tn] = [Wp tile j | Wr tile j].
    w_cat = jnp.concatenate(
        [wp_p.reshape(D_in_p, n_j, tn), wr_p.reshape(D_in_p, n_j, tn)], axis=2
    ).reshape(D_in_p, n_j * 2 * tn).astype(mxu_dtype)      # bf16 MXU feed
    b_cat = jnp.concatenate(
        [bp_p.reshape(1, n_j, tn), br_p.reshape(1, n_j, tn)], axis=2
    ).reshape(1, n_j * 2 * tn)                              # bias stays f32

    w_bytes = jnp.dtype(mxu_dtype).itemsize
    o_bytes = jnp.dtype(out_dtype).itemsize

    def apply(x):
        if x.ndim == 1:                 # PyTorch forward: unsqueeze 1-D input
            x = x[None, :]
        # TODO(synk): 0-D scalar-expansion branch of the reference forward is
        # host-side input plumbing and is not reproduced here.
        if x.shape[-1] != D_in:
            raise ValueError(f"expected input_dim={D_in}, got {x.shape}")
        B = x.shape[0]

        # Batch tile: big tiles amortize per-step overhead; on v7x make sure
        # at least 2 "parallel" tiles exist so both TensorCores run.
        tm = min(256, _round_up(B, 8))
        B_p = _round_up(B, tm)
        n_i = B_p // tm
        if n_i * n_j < 2 and B >= 16:
            tm = _round_up(-(-B // 2), 8)
            B_p = _round_up(B, tm)
            n_i = B_p // tm

        x_p = jnp.pad(x.astype(mxu_dtype), ((0, B_p - B), (0, D_in_p - D_in)))

        cost = pl.CostEstimate(
            flops=2 * B_p * D_in_p * (2 * D_out_p),
            transcendentals=3 * B_p * D_out_p,   # 2x tanh + 1x recip per element
            bytes_accessed=(
                w_bytes * n_j * B_p * D_in_p            # x re-streamed per j tile
                + w_bytes * n_i * D_in_p * 2 * D_out_p  # weights re-streamed per i tile
                + 4 * 2 * D_out_p                       # f32 bias
                + o_bytes * B_p * D_out_p               # output writeback
            ),
        )

        if n_k == 1:
            kernel = _tau_r_kernel_single_k
            scratch = []
        else:
            kernel = _tau_r_kernel_multi_k
            scratch = [pltpu.VMEM((tm, 2 * tn), jnp.float32)]

        out_p = pl.pallas_call(
            kernel,
            out_shape=jax.ShapeDtypeStruct((B_p, D_out_p), out_dtype),
            grid_spec=pltpu.PrefetchScalarGridSpec(
                num_scalar_prefetch=0,
                grid=(n_i, n_j, n_k),
                in_specs=[
                    pl.BlockSpec((tm, tk), lambda i, j, k: (i, k)),       # x
                    pl.BlockSpec((tk, 2 * tn), lambda i, j, k: (k, j)),   # [Wp|Wr]
                    pl.BlockSpec((1, 2 * tn), lambda i, j, k: (0, j)),    # [bp|br]
                ],
                out_specs=pl.BlockSpec((tm, tn), lambda i, j, k: (i, j)),
                scratch_shapes=scratch,
            ),
            compiler_params=pltpu.CompilerParams(
                dimension_semantics=("parallel", "parallel", "arbitrary"),
                # <= 48 MiB keeps us inside v7x's 64 MiB physical VMEM;
                # v5e/v6e (128 MiB) have ample headroom.
                vmem_limit_bytes=48 * 1024 * 1024,
            ),
            cost_estimate=cost,
        )(x_p, w_cat, b_cat)

        # Strip batch / output-column padding.
        return out_p[:B, :D_out]

    return apply


def xavier_uniform(key, fan_in, fan_out, gain):
    """Matches torch.nn.init.xavier_uniform_ bound: gain*sqrt(6/(fan_in+fan_out))."""
    bound = gain * math.sqrt(6.0 / (fan_in + fan_out))
    return jax.random.uniform(
        key, (fan_in, fan_out), dtype=jnp.float32, minval=-bound, maxval=bound
    )


if __name__ == "__main__":
    input_dim = 32
    output_dim = 32
    batch = 8

    key = jax.random.PRNGKey(0)
    k_x, k_wp, k_wr = jax.random.split(key, 3)

    # Deterministic parameter init (xavier_uniform gain=0.1, zero biases).
    wp = xavier_uniform(k_wp, input_dim, output_dim, gain=0.1)   # [D_in, D_out]
    wr = xavier_uniform(k_wr, input_dim, output_dim, gain=0.1)   # [D_in, D_out]
    bp = jnp.zeros((output_dim,), dtype=jnp.float32)
    br = jnp.zeros((output_dim,), dtype=jnp.float32)

    x = jax.random.normal(k_x, (batch, input_dim), dtype=jnp.float32)

    layer = make_tau_r_layer(wp, bp, wr, br)      # packs weights once
    out = jax.block_until_ready(layer(x))

    # Pure-JAX reference of the full PyTorch forward (all clamps included).
    def ref_forward(x_, wp_, bp_, wr_, br_):
        progress = jnp.tanh(x_ @ wp_ + bp_)
        risk = jnp.maximum(x_ @ wr_ + br_, 0.0)
        den = jnp.maximum(risk + BETA + EPSILON, MIN_DENOMINATOR)
        return jnp.clip(jnp.tanh((progress + ALPHA) / den), -10.0, 10.0)

    # (a) bf16-matched reference: isolates kernel math (tight tolerance).
    bf = lambda a: a.astype(jnp.bfloat16).astype(jnp.float32)
    ref_bf16 = ref_forward(bf(x), bf(wp), bp, bf(wr), br)
    # (b) exact f32 reference (true spec): looser tol covers bf16 MXU feed.
    ref_f32 = ref_forward(x, wp, bp, wr, br)

    assert out.shape == (batch, output_dim)
    assert jnp.allclose(out, ref_bf16, atol=5e-3, rtol=5e-3), (
        float(jnp.max(jnp.abs(out - ref_bf16)))
    )
    assert jnp.allclose(out, ref_f32, atol=3e-2, rtol=3e-2), (
        float(jnp.max(jnp.abs(out - ref_f32)))
    )

    print("KERNEL_OK")
</pallas_src>

<mosaic_0001>
module attributes {stable_mosaic.version = 11 : i64} {
  func.func @_tau_r_kernel_single_k(%arg0: i32, %arg1: i32, %arg2: i32, %arg3: memref<8x32xbf16, #tpu.memory_space<vmem>>, %arg4: memref<32x64xbf16, #tpu.memory_space<vmem>>, %arg5: memref<1x64xf32, #tpu.memory_space<vmem>>, %arg6: memref<8x32xf32, #tpu.memory_space<vmem>>) attributes {dimension_semantics = [#tpu.dimension_semantics<parallel>, #tpu.dimension_semantics<parallel>, #tpu.dimension_semantics<arbitrary>], iteration_bounds = array<i64: 1, 1, 1>, scalar_prefetch = 0 : i64, scratch_operands = 0 : i64, tpu.core_type = #tpu.core_type<tc>, window_params = [{transform_indices = @transform_0, window_bounds = array<i64: 8, 32>}, {transform_indices = @transform_1, window_bounds = array<i64: 32, 64>}, {transform_indices = @transform_2, window_bounds = array<i64: 1, 64>}, {transform_indices = @transform_3, window_bounds = array<i64: 8, 32>}]} {
    %c0 = arith.constant 0 : index
    %c0_0 = arith.constant 0 : index
    %0 = vector.load %arg3[%c0, %c0_0] : memref<8x32xbf16, #tpu.memory_space<vmem>>, vector<8x32xbf16>
    %c0_1 = arith.constant 0 : index
    %c0_2 = arith.constant 0 : index
    %1 = vector.load %arg4[%c0_1, %c0_2] : memref<32x64xbf16, #tpu.memory_space<vmem>>, vector<32x64xbf16>
    %cst = arith.constant dense<0.000000e+00> : vector<8x64xf32>
    %2 = tpu.matmul %0, %1, %cst {dimension_numbers = #tpu.dot_dimension_numbers<[1], [0], [0], [1], [0, 0, 1, 1], [], []>} : vector<8x32xbf16>, vector<32x64xbf16>, vector<8x64xf32> -> vector<8x64xf32>
    %c0_3 = arith.constant 0 : index
    %c0_4 = arith.constant 0 : index
    %3 = vector.load %arg5[%c0_3, %c0_4] : memref<1x64xf32, #tpu.memory_space<vmem>>, vector<1x64xf32>
    %4 = vector.broadcast %3 : vector<1x64xf32> to vector<8x64xf32>
    %5 = arith.addf %2, %4 : vector<8x64xf32>
    %6 = vector.extract_strided_slice %5 {offsets = [0, 0], sizes = [8, 32], strides = [1, 1]} : vector<8x64xf32> to vector<8x32xf32>
    %7 = math.tanh %6 : vector<8x32xf32>
    %8 = vector.extract_strided_slice %5 {offsets = [0, 32], sizes = [8, 32], strides = [1, 1]} : vector<8x64xf32> to vector<8x32xf32>
    %cst_5 = arith.constant 0.000000e+00 : f32
    %9 = vector.broadcast %cst_5 : f32 to vector<8x32xf32>
    %10 = arith.maximumf %8, %9 : vector<8x32xf32>
    %cst_6 = arith.constant 1.000010e-01 : f32
    %11 = vector.broadcast %cst_6 : f32 to vector<8x32xf32>
    %12 = arith.addf %10, %11 : vector<8x32xf32>
    %cst_7 = arith.constant 9.99999974E-6 : f32
    %13 = vector.broadcast %cst_7 : f32 to vector<8x32xf32>
    %14 = arith.maximumf %12, %13 : vector<8x32xf32>
    %cst_8 = arith.constant 1.000000e-01 : f32
    %15 = vector.broadcast %cst_8 : f32 to vector<8x32xf32>
    %16 = arith.addf %7, %15 : vector<8x32xf32>
    %17 = tpu.reciprocal %14 {approx = true} : vector<8x32xf32> -> vector<8x32xf32>
    %18 = arith.mulf %16, %17 : vector<8x32xf32>
    %19 = math.tanh %18 : vector<8x32xf32>
    %c0_9 = arith.constant 0 : index
    %c0_10 = arith.constant 0 : index
    %20 = vector.load %arg6[%c0_9, %c0_10] : memref<8x32xf32, #tpu.memory_space<vmem>>, vector<8x32xf32>
    tpu.vector_store %arg6[%c0_9, %c0_10], %19 {strides = array<i32>} : memref<8x32xf32, #tpu.memory_space<vmem>>, vector<8x32xf32>,
    return
  }
  func.func @transform_0(%arg0: i32, %arg1: i32, %arg2: i32) -> (i32, i32) {
    %c0_i32 = arith.constant 0 : i32
    return %arg0, %arg2 : i32, i32
  }
  func.func @transform_1(%arg0: i32, %arg1: i32, %arg2: i32) -> (i32, i32) {
    %c0_i32 = arith.constant 0 : i32
    return %arg2, %arg1 : i32, i32
  }
  func.func @transform_2(%arg0: i32, %arg1: i32, %arg2: i32) -> (i32, i32) {
    %c0_i32 = arith.constant 0 : i32
    %c0_i32_0 = arith.constant 0 : i32
    return %c0_i32, %arg1 : i32, i32
  }
  func.func @transform_3(%arg0: i32, %arg1: i32, %arg2: i32) -> (i32, i32) {
    %c0_i32 = arith.constant 0 : i32
    return %arg0, %arg1 : i32, i32
  }
}

</mosaic_0001>

<bundles_post_ra>
// kernel: tpu_custom_call.1
= control target key start
LH: loop header
LB: loop body
LE: loop exit
PB: predicated region body
PF: predicated region fallthrough
CT: control target
= control target key end

     0   :  { %8 = vsyncpa [#allocation3], 0  ;;  %s318_s0 = inlined_call_operand.hbm [shape: bf16[8,32], index: 0, kind: input, shape index: {}]   ;;  %s319_s1 = inlined_call_operand.hbm [shape: bf16[32,64], index: 1, kind: input, shape index: {}]   ;;  %s320_s2 = inlined_call_operand.vmem [shape: f32[1,64], index: 2, kind: input, shape index: {}]   ;;  %s321_s3 = inlined_call_operand.hbm [shape: f32[8,32], index: 3, kind: output, shape index: {}]  }
   0x1   :  { %9 = vsyncpa [#allocation6], 0 }
   0x2   :  { %10 = vsyncpa [#allocation4], 0  ;;  %s242_s12 = smov [#allocation2]   ;;  %s243_s14 = smov [#allocation5]  }
   0x3   :  { %s17_s13 = sshll.u32 %s242_s12, 4  ;;  %s26_s15 = sshll.u32 %s243_s14, 4  ;;  %s18_s13 = int_to_ptr.vmem [resolvable:$true] %s17_s13  ;;  %s270_s15 = int_to_ptr.vmem [resolvable:$true] %s26_s15 }
   0x4   :  { %s170_s18 = scalar_lea.hbm %s318_s0, 64 }
   0x5   :  { %p171_p0 = scmp.ne.s32.totalorder %s318_s0, %s170_s18  ;;  %p174_p1 = scmp.lt.u32.totalorder %s170_s18, %s318_s0 }
   0x7   :  { %p176_p2 = pnand %p174_p1, %p171_p0 }
   0x9   :  { %179 = shalt.err (!%p176_p2)
}
   0xa   :  { %s180_s23 = scalar_lea.vmem %s18_s13, 64  ;;  %p185_p4 = scmp.lt.s32.totalorder %s18_s13, %s18_s13 }
   0xb   :  { %p181_p3 = scmp.ne.s32.totalorder %s18_s13, %s180_s23  ;;  %p186_p5 = scmp.lt.s32.totalorder %s180_s23, %s180_s23 }
   0xd   :  { %p187_p6 = por %p186_p5, %p185_p4 }
   0xf   :  { %p188_p7 = pnand %p187_p6, %p181_p3 }
  0x11   :  { %191 = shalt.err (!%p188_p7)
}
  0x12   :  { %20 = dma.hbm_to_vmem [thread:$0]  %s318_s0, 64, %s18_s13, [#allocation3]  }
  0x13   :  { %s192_s28 = scalar_lea.hbm %s319_s1, 256 }
  0x14   :  { %p193_p8 = scmp.ne.s32.totalorder %s319_s1, %s192_s28  ;;  %p196_p9 = scmp.lt.u32.totalorder %s192_s28, %s319_s1 }
  0x16   :  { %p198_p10 = pnand %p196_p9, %p193_p8 }
  0x18   :  { %201 = shalt.err (!%p198_p10)
}
  0x19   :  { %s202_s6 = scalar_lea.vmem %s270_s15, 256  ;;  %p207_p12 = scmp.lt.s32.totalorder %s270_s15, %s270_s15 }
  0x1a   :  { %p203_p11 = scmp.ne.s32.totalorder %s270_s15, %s202_s6  ;;  %p208_p13 = scmp.lt.s32.totalorder %s202_s6, %s202_s6 }
  0x1c   :  { %p209_p0 = por %p208_p13, %p207_p12 }
  0x1e   :  { %p210_p1 = pnand %p209_p0, %p203_p11 }
  0x20   :  { %213 = shalt.err (!%p210_p1)
}
  0x21   :  { %s244_s0 = smov 64   ;;  %s245_s7 = smov 4  }
  0x22   :  { %32 = dma.hbm_to_vmem [thread:$0]  %s319_s1, 256, %s270_s15, [#allocation6], %s244_s0, %s244_s0, %s245_s7  }
  0x23   :  { %236 = dma.done.wait [#allocation3], 64  }
  0x24   :  { %237 = vsyncadd [#allocation3], 4294967232 }
  0x25   :  { %238 = dma.done.wait [#allocation6], 256  }
  0x26   :  { %239 = vsyncadd [#allocation6], 4294967040  ;;  %v246_v0 = vmov 0.0   ;;  %vm247_vm0 = vmmov 0   ;;  %v162_v1 = vld [vmem:[#allocation5] sm:$0xff]   ;;  %v163_v2 = vld [vmem:[#allocation5 + $0x8] sm:$0xff]  }
  0x27   :  { %146 = vmatprep.subr.bf16.mxu0 %v246_v0  ;;  %150 = vmatprep.mubr.msk.bf16.mxu0 %vm247_vm0, %v246_v0  ;;  %v42_v3 = vld [vmem:[#allocation2] sm:$0xf]  ;;  %vm66_vm1 = vcmask 261120   ;;  %s248_s1 = smov 96   ;;  %s249_s12 = smov [#allocation7]  }
  0x28   :  { %147 = vmatpush3.bf16.msra.mxu0 %v162_v1  ;;  %v139_v4 = vld [vmem:[%s320_s2] ss:$0 sm:$0xff]  ;;  %s129_s2 = sshll.u32 %s249_s12, 4  ;;  %s130_s2 = int_to_ptr.vmem [resolvable:$true] %s129_s2 }
  0x29   :  { %148 = vmatprep.subr.bf16.mxu0 %v246_v0  ;;  %s214_s13 = scalar_lea.vmem %s130_s2, 128  ;;  %p219_p3 = scmp.lt.s32.totalorder %s130_s2, %s130_s2 }
  0x2a   :  { %p215_p2 = scmp.ne.s32.totalorder %s130_s2, %s214_s13  ;;  %p220_p4 = scmp.lt.s32.totalorder %s214_s13, %s214_s13 }
  0x2c   :  { %149 = vmatpush3.bf16.msra.mxu0 %v163_v2  ;;  %p221_p5 = por %p220_p4, %p219_p3 }
  0x2e   :  { %p222_p6 = pnand %p221_p5, %p215_p2 }
  0x2f   :  { %151 = vmatmul.mubr.msk.bf16.vlgmr.msra.gmra.mrb[0].mxu0 %vm66_vm1, %v42_v3 }
 0x102   :  { %v104_v5 = vpop.f32.mrb[0].mxu0 }
 0x103   :  { %v105_v6 = vadd.f32 %v139_v4, %v104_v5  ;;  %v152_v7 = vpop.f32.mrb[1].mxu0 }
 0x104   :  { %v107_v8 = vpop.f32.mrb[2].mxu0 }
 0x105   :  { %v111_v9 = vmax.f32 %v105_v6, 0.0  ;;  %v153_v10 = vpop.f32.mrb[3].mxu0 }
 0x107   :  { %v112_v11 = vadd.f32 0.100001, %v111_v9 }
 0x109   :  { %v113_v12 = vmax.f32 %v112_v11, 1e-05 }
 0x10b   :  { %164 = vrcp.f32 %v113_v12 }
 0x10c   :  { %166 = vtanh.f32 %v105_v6 }
 0x115   :  { %v165_v13 = vpop.eup %164 }
 0x116   :  { %117 = vrot.lane.b32.xlu0 %v165_v13, %s248_s1  ;;  %v167_v14 = vpop.eup %166 }
 0x117   :  { %v114_v15 = vadd.f32 0.1, %v167_v14 }
 0x188   :  { %v118_v16 = vpop.permute.xlu0 %117 }
 0x189   :  { %v120_v17 = vmul.f32 %v118_v16, %v114_v15 }
 0x18b   :  { %168 = vtanh.f32 %v120_v17 }
 0x195   :  { %v169_v18 = vpop.eup %168 }
 0x196   :  { %122 = vst.msk [vmem:[#allocation7] sm:$0xff] %vm66_vm1, %v169_v18 }
 0x197   :  { %225 = shalt.err (!%p222_p6)
}
 0x198   :  { %s226_s16 = scalar_lea.hbm %s321_s3, 128 }
 0x199   :  { %p227_p7 = scmp.ne.s32.totalorder %s321_s3, %s226_s16  ;;  %p230_p8 = scmp.lt.u32.totalorder %s226_s16, %s321_s3 }
 0x19b   :  { %p232_p9 = pnand %p230_p8, %p227_p7 }
 0x19d   :  { %235 = shalt.err (!%p232_p9)
}
 0x19e   :  { %132 = dma.vmem_to_hbm [thread:$0]  %s130_s2, 128, %s321_s3, [#allocation4]  }
 0x19f   :  { %240 = dma.done.wait [#allocation4], 128  }
 0x1a0   :  { %241 = vsyncadd [#allocation4], 4294967168 }
 0x1a1   :  { %136 = vsyncpa [#allocation3], 1 }
 0x1a2   :  { %137 = vsyncpa [#allocation6], 1 }
 0x1a3   :  { %138 = vsyncpa [#allocation4], 1 }

</bundles_post_ra>
